<compile_context>
chip_gen: v7x
topology: tpu7x:2x2x1
jax: 0.10.0
libtpu: 0.0.40
codegen_flags: <defaults>
</compile_context>

<pallas_src>
import math

import jax
import jax.numpy as jnp
from jax.experimental import pallas as pl
from jax.experimental.pallas import tpu as pltpu

_MAX_TC = 2048   # lane-dim tile cap (f32 lanes)
_MAX_TR = 256    # sublane-dim tile cap (rows)


# ---------------------------------------------------------------------------
# complex64 <-> interleaved float32 pair view (zero-copy bitcast when possible)
# ---------------------------------------------------------------------------
_COMPLEX_BITCAST_OK = None


def _complex_bitcast_supported() -> bool:
    """Eagerly probe (once) whether lax.bitcast_convert_type handles complex64."""
    global _COMPLEX_BITCAST_OK
    if _COMPLEX_BITCAST_OK is None:
        try:
            probe = jnp.array([1.0 + 2.0j], dtype=jnp.complex64)
            fwd = jax.block_until_ready(
                jax.lax.bitcast_convert_type(probe, jnp.float32))
            bwd = jax.block_until_ready(
                jax.lax.bitcast_convert_type(fwd, jnp.complex64))
            _COMPLEX_BITCAST_OK = (
                fwd.shape == (1, 2)
                and bool(jnp.allclose(fwd, jnp.array([[1.0, 2.0]], jnp.float32)))
                and bwd.shape == (1,)
                and bool(jnp.allclose(bwd, probe))
            )
        except Exception:
            _COMPLEX_BITCAST_OK = False
    return _COMPLEX_BITCAST_OK


def _c64_to_f32_pairs(x):
    """complex64 (...,) -> float32 (..., 2) with [..., 0]=re, [..., 1]=im."""
    if _complex_bitcast_supported():
        return jax.lax.bitcast_convert_type(x, jnp.float32)
    # TODO(synk): lax.bitcast_convert_type rejects complex dtypes on this JAX
    # version; this fallback costs one extra fused HBM pass each way.
    return jnp.stack([jnp.real(x), jnp.imag(x)], axis=-1)


def _f32_pairs_to_c64(y):
    """float32 (..., 2) -> complex64 (...,)."""
    if _complex_bitcast_supported():
        return jax.lax.bitcast_convert_type(y, jnp.complex64)
    return jax.lax.complex(y[..., 0], y[..., 1])


# ---------------------------------------------------------------------------
# Kernel
# ---------------------------------------------------------------------------
def _modrelu_kernel(x_ref, b_ref, o_ref):
    # x: (TR, TC) f32, lanes = [re0, im0, re1, im1, ...]
    # b: (1, TC) or (TR, TC); each bias value is duplicated onto both lanes of
    #    its pair, so it aligns / broadcasts elementwise with x.
    x = x_ref[...]
    b = b_ref[...]
    tc = x.shape[-1]

    x2 = x * x
    lane = jax.lax.broadcasted_iota(jnp.int32, x.shape, 1)
    is_re = (lane & 1) == 0

    # Partner square: a 're' lane needs the 'im' square at lane j+1, an 'im'
    # lane needs the 're' square at lane j-1.  pltpu.roll follows jnp.roll
    # semantics (out[j] = in[(j - shift) % n]); wrap-around lanes are never
    # selected by the parity mask because tc is even.
    partner = jnp.where(
        is_re,
        pltpu.roll(x2, tc - 1, 1),   # roll by -1: brings x2[j+1] to lane j
        pltpu.roll(x2, 1, 1),        # brings x2[j-1] to lane j
    )
    s = x2 + partner                 # |x|^2, identical on both lanes of a pair
    nz = s > 0.0

    # NOTE: squares can over/underflow for |x| outside ~[1e-19, 1.8e19]; fine
    # for normal activations (torch.abs uses a hypot-style rescale there).
    inv_mag = jax.lax.rsqrt(jnp.where(nz, s, 1.0))   # 1/|x| on the EUP, safe at 0
    scale = jnp.maximum(1.0 + b * inv_mag, 0.0)      # relu(|x| + b) / |x|
    # x == 0: torch.angle(0) == 0, so the result is relu(b) + 0j.
    zero_case = jnp.where(is_re, jnp.maximum(b, 0.0), 0.0)
    o_ref[...] = jnp.where(nz, x * scale, zero_case)


# ---------------------------------------------------------------------------
# Wrapper
# ---------------------------------------------------------------------------
def _modrelu_impl(x, b):
    """ModReLU forward: torch.polar(relu(|x| + b), angle(x)).

    x: complex64 (B, *feature_dim);  b: float (1, *feature_dim).
    """
    x = x.astype(jnp.complex64)
    B = x.shape[0]
    feat = x.shape[1:]
    F = math.prod(feat)
    assert b.shape == (1, *feat), (b.shape, feat)

    # complex -> interleaved f32 pairs, flattened onto the lane axis.
    xf = _c64_to_f32_pairs(x).reshape(B, 2 * F)
    bf = b.reshape(F).astype(jnp.float32)
    b2 = jnp.stack([bf, bf], axis=-1).reshape(1, 2 * F)  # bias on both pair lanes (tiny)

    # Fold leading feature elements into rows when the batch is sublane-sparse.
    K = 1
    if B < 8:
        for d in range(8, min(F, 256) + 1, 8):
            if F % d == 0 and (2 * F) // d >= 128:
                K = d
                break
    R, C = B * K, (2 * F) // K
    xf = xf.reshape(R, C)
    b2 = b2.reshape(K, C)

    # Tile selection.  No explicit padding: boundary blocks are masked by Pallas.
    if K > 1:
        TR = K                                   # bias block rows == x block rows
    elif R <= 8:
        TR = R                                   # full row dim (always legal)
    else:
        TR = _MAX_TR if R >= 2 * _MAX_TR else max(8, ((R + 1) // 2) // 8 * 8)
    TC = C if C <= _MAX_TC else _MAX_TC
    assert TC % 2 == 0                           # (re, im) pairs never split

    n_r = pl.cdiv(R, TR)
    n_c = pl.cdiv(C, TC)

    cost = pl.CostEstimate(
        flops=12 * R * C,
        transcendentals=R * C,
        bytes_accessed=(2 * R * C + K * C) * 4,  # x in + out + bias
    )

    out = pl.pallas_call(
        _modrelu_kernel,
        out_shape=jax.ShapeDtypeStruct((R, C), jnp.float32),
        grid=(n_c, n_r),                         # rows innermost -> bias tile reused
        in_specs=[
            pl.BlockSpec((TR, TC), lambda j, i: (i, j)),
            pl.BlockSpec((K, TC), lambda j, i: (0, j)),
        ],
        out_specs=pl.BlockSpec((TR, TC), lambda j, i: (i, j)),
        compiler_params=pltpu.CompilerParams(
            dimension_semantics=("parallel", "parallel"),
            vmem_limit_bytes=48 * 1024 * 1024,
        ),
        cost_estimate=cost,
    )(xf, b2)

    return _f32_pairs_to_c64(out.reshape(B, *feat, 2))


modrelu = jax.jit(_modrelu_impl)


if __name__ == "__main__":
    B, feat = 2, (4, 16, 16)

    key = jax.random.PRNGKey(0)
    kr, ki, kb = jax.random.split(key, 3)
    x = jax.lax.complex(
        jax.random.normal(kr, (B, *feat), dtype=jnp.float32),
        jax.random.normal(ki, (B, *feat), dtype=jnp.float32),
    )
    # Matches the module's init: b = torch.rand(1, *feature_dim) in [0, 1).
    b = jax.random.uniform(kb, (1, *feat), dtype=jnp.float32)

    y = jax.block_until_ready(modrelu(x, b))

    # Pure-JAX reference: torch.polar(relu(|x| + b), angle(x)).
    new_mag = jnp.maximum(jnp.abs(x) + b, 0.0)
    ang = jnp.angle(x)
    y_ref = jax.lax.complex(new_mag * jnp.cos(ang), new_mag * jnp.sin(ang))

    ok = (
        y.shape == x.shape
        and y.dtype == jnp.complex64
        and bool(jnp.allclose(y, y_ref, atol=1e-4, rtol=1e-4))
    )
    if ok:
        print("KERNEL_OK")
</pallas_src>

<mosaic_0001>
module attributes {stable_mosaic.version = 11 : i64} {
  func.func @_modrelu_kernel(%arg0: i32, %arg1: i32, %arg2: memref<8x256xf32, #tpu.memory_space<vmem>>, %arg3: memref<8x256xf32, #tpu.memory_space<vmem>>, %arg4: memref<8x256xf32, #tpu.memory_space<vmem>>) attributes {dimension_semantics = [#tpu.dimension_semantics<parallel>, #tpu.dimension_semantics<parallel>], iteration_bounds = array<i64: 1, 2>, scalar_prefetch = 0 : i64, scratch_operands = 0 : i64, tpu.core_type = #tpu.core_type<tc>, window_params = [{transform_indices = @transform_0, window_bounds = array<i64: 8, 256>}, {transform_indices = @transform_1, window_bounds = array<i64: 8, 256>}, {transform_indices = @transform_2, window_bounds = array<i64: 8, 256>}]} {
    %c0 = arith.constant 0 : index
    %c0_0 = arith.constant 0 : index
    %0 = vector.load %arg2[%c0, %c0_0] : memref<8x256xf32, #tpu.memory_space<vmem>>, vector<8x256xf32>
    %c0_1 = arith.constant 0 : index
    %c0_2 = arith.constant 0 : index
    %1 = vector.load %arg3[%c0_1, %c0_2] : memref<8x256xf32, #tpu.memory_space<vmem>>, vector<8x256xf32>
    %2 = arith.mulf %0, %0 : vector<8x256xf32>
    %3 = tpu.iota {dimensions = array<i32: 1>} : vector<8x256xi32>
    %c1_i32 = arith.constant 1 : i32
    %4 = vector.broadcast %c1_i32 : i32 to vector<8x256xi32>
    %5 = arith.andi %3, %4 : vector<8x256xi32>
    %c0_i32 = arith.constant 0 : i32
    %6 = vector.broadcast %c0_i32 : i32 to vector<8x256xi32>
    %7 = arith.cmpi eq, %5, %6 : vector<8x256xi32>
    %c255_i32 = arith.constant 255 : i32
    %8 = tpu.dynamic_rotate %2 by %c255_i32 dim 1 : vector<8x256xf32>, i32 -> vector<8x256xf32>
    %c1_i32_3 = arith.constant 1 : i32
    %9 = tpu.dynamic_rotate %2 by %c1_i32_3 dim 1 : vector<8x256xf32>, i32 -> vector<8x256xf32>
    %10 = arith.select %7, %8, %9 : vector<8x256xi1>, vector<8x256xf32>
    %11 = arith.addf %2, %10 : vector<8x256xf32>
    %cst = arith.constant 0.000000e+00 : f32
    %12 = vector.broadcast %cst : f32 to vector<8x256xf32>
    %13 = arith.cmpf ogt, %11, %12 : vector<8x256xf32>
    %cst_4 = arith.constant 1.000000e+00 : f32
    %14 = vector.broadcast %cst_4 : f32 to vector<8x256xf32>
    %15 = arith.select %13, %11, %14 : vector<8x256xi1>, vector<8x256xf32>
    %16 = math.rsqrt %15 : vector<8x256xf32>
    %17 = arith.mulf %1, %16 : vector<8x256xf32>
    %cst_5 = arith.constant 1.000000e+00 : f32
    %18 = vector.broadcast %cst_5 : f32 to vector<8x256xf32>
    %19 = arith.addf %18, %17 : vector<8x256xf32>
    %cst_6 = arith.constant 0.000000e+00 : f32
    %20 = vector.broadcast %cst_6 : f32 to vector<8x256xf32>
    %21 = arith.maximumf %19, %20 : vector<8x256xf32>
    %cst_7 = arith.constant 0.000000e+00 : f32
    %22 = vector.broadcast %cst_7 : f32 to vector<8x256xf32>
    %23 = arith.maximumf %1, %22 : vector<8x256xf32>
    %cst_8 = arith.constant 0.000000e+00 : f32
    %24 = vector.broadcast %cst_8 : f32 to vector<8x256xf32>
    %25 = arith.select %7, %23, %24 : vector<8x256xi1>, vector<8x256xf32>
    %26 = arith.mulf %0, %21 : vector<8x256xf32>
    %27 = arith.select %13, %26, %25 : vector<8x256xi1>, vector<8x256xf32>
    %c0_9 = arith.constant 0 : index
    %c0_10 = arith.constant 0 : index
    %28 = vector.load %arg4[%c0_9, %c0_10] : memref<8x256xf32, #tpu.memory_space<vmem>>, vector<8x256xf32>
    tpu.vector_store %arg4[%c0_9, %c0_10], %27 {strides = array<i32>} : memref<8x256xf32, #tpu.memory_space<vmem>>, vector<8x256xf32>,
    return
  }
  func.func @transform_0(%arg0: i32, %arg1: i32) -> (i32, i32) {
    %c0_i32 = arith.constant 0 : i32
    return %arg1, %arg0 : i32, i32
  }
  func.func @transform_1(%arg0: i32, %arg1: i32) -> (i32, i32) {
    %c0_i32 = arith.constant 0 : i32
    %c0_i32_0 = arith.constant 0 : i32
    return %c0_i32, %arg0 : i32, i32
  }
  func.func @transform_2(%arg0: i32, %arg1: i32) -> (i32, i32) {
    %c0_i32 = arith.constant 0 : i32
    return %arg1, %arg0 : i32, i32
  }
}

</mosaic_0001>

<bundles_post_ra>
// kernel: custom-call
= control target key start
LH: loop header
LB: loop body
LE: loop exit
PB: predicated region body
PF: predicated region fallthrough
CT: control target
= control target key end

     0   :  { %2 = vsyncpa [#allocation0], 0  ;;  %s61_s0 = inlined_call_operand.hbm [shape: c64[2,4,16,16], index: 0, kind: input, shape index: {}]   ;;  %s62_s1 = inlined_call_operand.vmem [shape: f32[2,4,16,16], index: 1, kind: output, shape index: {}]  }
   0x1   :  { %s3_s8 = sshll.u32 %s62_s1, 4  ;;  %s9_s11 = scalar_lea.hbm %s61_s0, 2048  ;;  %s4_s8 = int_to_ptr.vmem [resolvable:$true] %s3_s8 }
   0x2   :  { %p10_p0 = scmp.ne.s32.totalorder %s61_s0, %s9_s11  ;;  %s11_s16 = scalar_lea.hbm %s61_s0, 4096 }
   0x3   :  { %p12_p1 = scmp.lt.u32.totalorder %s11_s16, %s9_s11  ;;  %p13_p2 = scmp.lt.u32.totalorder %s9_s11, %s61_s0 }
   0x5   :  { %p14_p3 = por %p13_p2, %p12_p1 }
   0x7   :  { %p15_p4 = pnand %p14_p3, %p10_p0 }
   0x9   :  { %18 = shalt.err (!%p15_p4)  }
   0xa   :  { %s19_s1 = scalar_lea.vmem %s4_s8, 2048  ;;  %p24_p6 = scmp.lt.s32.totalorder %s4_s8, %s4_s8 }
   0xb   :  { %p20_p5 = scmp.ne.s32.totalorder %s4_s8, %s19_s1  ;;  %p25_p7 = scmp.lt.s32.totalorder %s19_s1, %s19_s1 }
   0xd   :  { %p26_p8 = por %p25_p7, %p24_p6 }
   0xf   :  { %p27_p9 = pnand %p26_p8, %p20_p5 }
  0x11   :  { %30 = shalt.err (!%p27_p9)  }
  0x12   :  { %6 = dma.hbm_to_vmem [thread:$0]  %s61_s0, 2048, %s4_s8, [#allocation0] }
  0x13   :  { %31 = dma.done.wait [#allocation0], 2048  }
  0x14   :  { %32 = vsyncadd [#allocation0], 4294965248 }
  0x15   :  { %8 = vsyncpa [#allocation0], 1 }

// kernel: custom-call.1
= control target key start
LH: loop header
LB: loop body
LE: loop exit
PB: predicated region body
PF: predicated region fallthrough
CT: control target
= control target key end

     0   :  { %s59_s0 = inlined_call_operand.hbm [shape: c64[2,4,16,16], index: 0, kind: input, shape index: {}]   ;;  %s60_s1 = inlined_call_operand.vmem [shape: f32[2,4,16,16], index: 1, kind: output, shape index: {}]  }
   0x1   :  { %s2_s8 = scalar_lea.hbm %s59_s0, 2048 }
   0x2   :  { %3 = vsyncpa [#allocation0], 0  ;;  %s4_s11 = sshll.u32 %s60_s1, 4  ;;  %s34_s14 = scalar_lea.hbm %s59_s0, 4096  ;;  %s5_s11 = int_to_ptr.vmem [resolvable:$true] %s4_s11 }
   0x3   :  { %p11_p0 = scmp.ne.s32.totalorder %s2_s8, %s34_s14  ;;  %p13_p1 = scmp.lt.u32.totalorder %s2_s8, %s59_s0 }
   0x4   :  { %p14_p2 = scmp.lt.u32.totalorder %s34_s14, %s34_s14  ;;  %p16_p4 = scmp.lt.u32.totalorder %s34_s14, %s2_s8 }
   0x6   :  { %p15_p3 = por %p14_p2, %p13_p1 }
   0x8   :  { %p17_p5 = por %p16_p4, %p15_p3 }
   0xa   :  { %p18_p6 = pnand %p17_p5, %p11_p0 }
   0xc   :  { %21 = shalt.err (!%p18_p6)  }
   0xd   :  { %s22_s17 = scalar_lea.vmem %s5_s11, 2048  ;;  %p27_p8 = scmp.lt.s32.totalorder %s5_s11, %s5_s11 }
   0xe   :  { %p23_p7 = scmp.ne.s32.totalorder %s5_s11, %s22_s17  ;;  %p28_p9 = scmp.lt.s32.totalorder %s22_s17, %s22_s17 }
  0x10   :  { %p29_p10 = por %p28_p9, %p27_p8 }
  0x12   :  { %p30_p11 = pnand %p29_p10, %p23_p7 }
  0x14   :  { %33 = shalt.err (!%p30_p11)  }
  0x15   :  { %7 = dma.hbm_to_vmem [thread:$0]  %s2_s8, 2048, %s5_s11, [#allocation0] }
  0x16   :  { %35 = dma.done.wait [#allocation0], 2048  }
  0x17   :  { %36 = vsyncadd [#allocation0], 4294965248 }
  0x18   :  { %9 = vsyncpa [#allocation0], 1 }

// kernel: _modrelu_impl.1
= control target key start
LH: loop header
LB: loop body
LE: loop exit
PB: predicated region body
PF: predicated region fallthrough
CT: control target
= control target key end

     0   :  { %s445_s9 = smov 0   ;;  %s447_s10 = smov 0   ;;  %s511_s0 = inlined_call_operand.vmem [shape: f32[16,256], index: 0, kind: input, shape index: {}]   ;;  %s512_s1 = inlined_call_operand.vmem [shape: f32[8,256], index: 1, kind: input, shape index: {}]   ;;  %s513_s2 = inlined_call_operand.vmem [shape: f32[16,256], index: 2, kind: output, shape index: {}]  }
   0x1   :  { %s449_s11 = smov 0  }
   0x2 LB: > { %s21_s12 = sadd.s32 1, %s422_s10  ;;  %p365_p0 = scmp.ge.s32.totalorder %s426_s11, 1  ;;  %s426_s11 = sphi %s449_s11, %s12_s11   ;;  %s422_s10 = sphi %s447_s10, %s519_s10   ;;  %s418_s9 = sphi %s445_s9, %s518_s9  }
   0x3   : > { %p22_p1 = scmp.ge.s32.totalorder %s21_s12, 2  ;;  %p144_p2 = scmp.lt.s32.totalorder %s426_s11, 3 }
   0x5   : > { %s521_s12 = smov (%p22_p1, %s21_s12), 0  ;;  %p145_p3 = pnand %p365_p0, %p144_p2 }
   0x6   : > { %p180_p4 = scmp.lt.s32.totalorder (!%p145_p3), %s418_s9, 1  ;;  %s428_s17 = smov (!%p145_p3), 1   ;;  %v211_v4 = vlaneseq (!%p145_p3)  ;;  %v207_v25 = vld [vmem:[%s512_s1] sm:$0xff] (!%p145_p3)  ;;  %v208_v26 = vld [vmem:[%s512_s1 + $0x8] sm:$0xff] (!%p145_p3) }
   0x7   : > { %148 = sbr.rel (%p145_p3) target bundleno = 167 (0xa7), region = 28  ;;  %s429_s18 = smov (!%p145_p3), 127   ;;  %v248_v30 = vmax.f32 (!%p145_p3), %v207_v25, 0.0  ;;  %v249_v32 = vmax.f32 (!%p145_p3), %v208_v26, 0.0 }
   0x8   : > { %v212_v5 = vand.u32 (!%p145_p3), 127, %v211_v4 }
   0xa   : > { %v213_v6 = vadd.s32 (!%p145_p3), 128, %v212_v5  ;;  %v214_v7 = vand.u32 (!%p145_p3), 1, %v212_v5  ;;  %vm229_vm0 = vcmp.lt.s32.totalorder (!%p145_p3), %v212_v5, 1  ;;  %vm222_vm1 = vcmp.lt.s32.totalorder (!%p145_p3), %v212_v5, 127 }
   0xc   : > { %v215_v8 = vand.u32 (!%p145_p3), 1, %v213_v6  ;;  %vm471_vm2 = vcmp.eq.s32.totalorder (!%p145_p3), %v214_v7, 0 }
   0xd   : > { %v250_v36 = vsel (!%p145_p3), %vm471_vm2, %v248_v30, 0.0 }
   0xe   : > { %s523_s9 = smov (!%p180_p4, %s418_s9), 1  ;;  %vm475_vm3 = vcmp.eq.s32.totalorder %v215_v8, 0 }
   0xf   : > { %s372_s13 = sshll.u32 %s523_s9, 4  ;;  %v251_v38 = vsel %vm475_vm3, %v249_v32, 0.0 }
  0x10   : > { %s187_s16 = scalar_lea.vmem %s511_s0, %s372_s13  ;;  %s203_s25 = scalar_lea.vmem %s513_s2, %s372_s13 }
  0x11   : > { %v205_v0 = vld [vmem:[%s187_s16] sm:$0xff]  ;;  %v206_v1 = vld [vmem:[%s187_s16 + $0x8] sm:$0xff] }
  0x12   : > { %v209_v2 = vmul.f32 %v205_v0, %v205_v0  ;;  %v210_v3 = vmul.f32 %v206_v1, %v206_v1 }
  0x14   : > { %225 = vrot.lane.b32.xlu1 %v209_v2, %s428_s17  ;;  %218 = vrot.lane.b32.xlu0 %v209_v2, %s429_s18 }
  0x18   : > { %227 = vrot.lane.b32.xlu1 %v210_v3, %s428_s17  ;;  %220 = vrot.lane.b32.xlu0 %v210_v3, %s429_s18 }
  0x86   : > { %v226_v9 = vpop.permute.xlu1 %225  ;;  %v219_v10 = vpop.permute.xlu0 %218 }
  0x8a   : > { %v228_v13 = vpop.permute.xlu1 %227  ;;  %v221_v14 = vpop.permute.xlu0 %220 }
  0x8b   : > { %v230_v15 = vsel %vm229_vm0, %v226_v9, %v228_v13  ;;  %v231_v16 = vsel %vm229_vm0, %v228_v13, %v226_v9  ;;  %v223_v17 = vsel %vm222_vm1, %v219_v10, %v221_v14  ;;  %v224_v18 = vsel %vm222_vm1, %v221_v14, %v219_v10 }
  0x8c   : > { %v232_v19 = vsel %vm471_vm2, %v223_v17, %v231_v16  ;;  %v233_v20 = vsel %vm475_vm3, %v224_v18, %v230_v15 }
  0x8d   : > { %v234_v21 = vadd.f32 %v232_v19, %v209_v2  ;;  %v235_v22 = vadd.f32 %v233_v20, %v210_v3 }
  0x8f   : > { %vm236_vm4 = vcmp.gt.f32.partialorder %v234_v21, 0.0  ;;  %vm237_vm5 = vcmp.gt.f32.partialorder %v235_v22, 0.0 }
  0x90   : > { %v238_v23 = vsel %vm236_vm4, %v234_v21, 1.0  ;;  %v239_v24 = vsel %vm237_vm5, %v235_v22, 1.0 }
  0x91   : > { %400 = vrsqrt.f32 %v238_v23 }
  0x92   : > { %402 = vrsqrt.f32 %v239_v24 }
  0x9b   : > { %v401_v27 = vpop.eup %400 }
  0x9c   : > { %v403_v28 = vpop.eup %402  ;;  %v242_v29 = vmul.f32 %v401_v27, %v207_v25 }
  0x9d   : > { %v243_v31 = vmul.f32 %v403_v28, %v208_v26 }
  0x9e   : > { %v244_v33 = vadd.f32 1.0, %v242_v29 }
  0x9f   : > { %v245_v34 = vadd.f32 1.0, %v243_v31 }
  0xa0   : > { %v246_v35 = vmax.f32 %v244_v33, 0.0 }
  0xa1   : > { %v247_v37 = vmax.f32 %v245_v34, 0.0 }
  0xa2   : > { %v252_v39 = vmul.f32 %v246_v35, %v205_v0 }
  0xa3   : > { %v253_v40 = vmul.f32 %v247_v37, %v206_v1 }
  0xa4   : > { %v254_v41 = vsel %vm236_vm4, %v252_v39, %v250_v36 }
  0xa5   : > { %v255_v42 = vsel %vm237_vm5, %v253_v40, %v251_v38  ;;  %256 = vst [vmem:[%s203_s25] sm:$0xff] %v254_v41 }
  0xa6   : > { %257 = vst [vmem:[%s203_s25 + $0x8] sm:$0xff] %v255_v42 }
  0xa7 PF: > { %s12_s11 = sadd.s32 1, %s426_s11   ;;  %s518_s9 = smov %s422_s10 }
  0xa8   : > { %p9_p5 = scmp.ge.s32.totalorder %s12_s11, 4   ;;  %s519_s10 = smov %s521_s12 }
  0xaa   :  { %11 = sbr.rel (!%p9_p5) target bundleno = 2 (0x2), region = 61 }

// kernel: custom-call.2
= control target key start
LH: loop header
LB: loop body
LE: loop exit
PB: predicated region body
PF: predicated region fallthrough
CT: control target
= control target key end

     0   :  { %s126_s0 = inlined_call_operand.vmem [shape: f32[2,4,16,16], index: 0, kind: input, shape index: {}]   ;;  %s127_s1 = inlined_call_operand.vmem [shape: f32[2,4,16,16], index: 1, kind: input, shape index: {}]   ;;  %s128_s2 = inlined_call_operand.hbm [shape: c64[2,4,16,16], index: 2, kind: output, shape index: {}]  }
   0x1   :  { %s87_s11 = scalar_lea.hbm %s128_s2, 2048 }
   0x2   :  { %4 = vsyncpa [#allocation0], 0  ;;  %s5_s14 = sshll.u32 %s126_s0, 4  ;;  %s6_s14 = int_to_ptr.vmem [resolvable:$true] %s5_s14 }
   0x3   :  { %s18_s15 = scalar_lea.vmem %s6_s14, 2048  ;;  %p23_p1 = scmp.lt.s32.totalorder %s6_s14, %s6_s14 }
   0x4   :  { %p19_p0 = scmp.ne.s32.totalorder %s6_s14, %s18_s15  ;;  %p24_p2 = scmp.lt.s32.totalorder %s18_s15, %s18_s15 }
   0x6   :  { %p25_p3 = por %p24_p2, %p23_p1 }
   0x8   :  { %p26_p4 = pnand %p25_p3, %p19_p0 }
   0xa   :  { %29 = shalt.err (!%p26_p4)  }
   0xb   :  { %p31_p5 = scmp.ne.s32.totalorder %s128_s2, %s87_s11  ;;  %s32_s0 = scalar_lea.hbm %s128_s2, 4096 }
   0xc   :  { %p33_p6 = scmp.lt.u32.totalorder %s32_s0, %s87_s11  ;;  %p34_p7 = scmp.lt.u32.totalorder %s87_s11, %s128_s2 }
   0xe   :  { %p35_p8 = por %p34_p7, %p33_p6 }
  0x10   :  { %p36_p9 = pnand %p35_p8, %p31_p5 }
  0x12   :  { %39 = shalt.err (!%p36_p9)  }
  0x13   :  { %8 = dma.vmem_to_hbm [thread:$0]  %s6_s14, 2048, %s128_s2, [#allocation0] }
  0x14   :  { %65 = dma.done.wait [#allocation0], 2048  }
  0x15   :  { %66 = vsyncadd [#allocation0], 4294965248 }
  0x16   :  { %10 = vsyncpa [#allocation0], 1 }
  0x17   :  { %11 = vsyncpa [#allocation1], 0  ;;  %s12_s28 = sshll.u32 %s127_s1, 4  ;;  %s13_s28 = int_to_ptr.vmem [resolvable:$true] %s12_s28 }
  0x18   :  { %s40_s29 = scalar_lea.vmem %s13_s28, 2048  ;;  %p45_p11 = scmp.lt.s32.totalorder %s13_s28, %s13_s28 }
  0x19   :  { %p41_p10 = scmp.ne.s32.totalorder %s13_s28, %s40_s29  ;;  %p46_p12 = scmp.lt.s32.totalorder %s40_s29, %s40_s29 }
  0x1b   :  { %p47_p13 = por %p46_p12, %p45_p11 }
  0x1d   :  { %p48_p0 = pnand %p47_p13, %p41_p10 }
  0x1f   :  { %51 = shalt.err (!%p48_p0)  }
  0x20   :  { %p53_p1 = scmp.ne.s32.totalorder %s87_s11, %s32_s0  ;;  %p56_p2 = scmp.lt.u32.totalorder %s32_s0, %s32_s0 }
  0x22   :  { %p57_p3 = por %p56_p2, %p34_p7 }
  0x24   :  { %p59_p4 = por %p57_p3, %p33_p6 }
  0x26   :  { %p60_p5 = pnand %p59_p4, %p53_p1 }
  0x28   :  { %63 = shalt.err (!%p60_p5)  }
  0x29   :  { %15 = dma.vmem_to_hbm [thread:$0]  %s13_s28, 2048, %s87_s11, [#allocation1] }
  0x2a   :  { %67 = dma.done.wait [#allocation1], 2048  }
  0x2b   :  { %68 = vsyncadd [#allocation1], 4294965248 }
  0x2c   :  { %17 = vsyncpa [#allocation1], 1 }

</bundles_post_ra>
